<compile_context>
chip_gen: v7x
topology: tpu7x:2x2x1
jax: 0.10.0
libtpu: 0.0.40
codegen_flags: <defaults>
</compile_context>

<pallas_src>
import functools
import math

import jax
import jax.numpy as jnp
from jax.experimental import pallas as pl
from jax.experimental.pallas import tpu as pltpu

_MIB = 1024 * 1024


def _chip_config():
    """Best-effort chip detection -> tiling/VMEM policy (defensive: falls back to a
    conservative v7x-like config if the hardware cannot be identified)."""
    kind = ""
    try:
        kind = jax.devices()[0].device_kind.lower()
    except Exception:
        pass
    vmem_phys = None
    try:
        vmem_phys = int(pltpu.get_tpu_info().vmem_capacity_bytes)
    except Exception:
        vmem_phys = None

    is_v5e = "v5" in kind
    is_v6e = "v6" in kind
    looks_v7 = "7" in kind
    big_vmem = is_v5e or is_v6e or (vmem_phys is not None and vmem_phys >= 96 * _MIB)

    if big_vmem and not looks_v7:
        # 128 MiB single-TensorCore parts (v5e / v6e): big tiles, no forced grid split.
        two_tc = False
        vmem_limit = 100 * _MIB
        tile_budget = 56 * _MIB
    else:
        # v7x (64 MiB per TC, 2 TCs) or unknown hardware: conservative budgets.
        two_tc = True
        vmem_limit = 48 * _MIB
        tile_budget = 24 * _MIB

    if vmem_phys is not None:
        vmem_limit = min(vmem_limit, max(int(0.75 * vmem_phys), 8 * _MIB))
        tile_budget = min(tile_budget, max(vmem_limit // 2, 4 * _MIB))

    # v5e: keep K ~ 128 so the (128x128) MXU is filled without W-fold FLOP inflation
    # flipping the kernel compute-bound.  v6e/v7x: fold as much as is reasonable.
    target_k = 128 if is_v5e else 2048
    return {
        "two_tc": two_tc,
        "is_v5e": is_v5e,
        "vmem_limit": vmem_limit,
        "tile_budget": tile_budget,
        "target_k": target_k,
    }


def _pick_group(W, Cin, Cout, target_k, max_weight_bytes=4 * _MIB):
    """Largest divisor G of W such that the grouped weight (G*Cin, 4*G*Cout) keeps
    K = G*Cin <= target_k and stays small in VMEM."""
    best = 1
    for g in range(1, W + 1):
        if W % g != 0:
            continue
        k = g * Cin
        wbytes = k * (4 * g * Cout) * 4
        if k <= target_k and wbytes <= max_weight_bytes:
            best = g
    return best


def _pick_tile_rows(R, W, Cin, Cout, G, cfg):
    """Largest image-row tile fitting the VMEM budget (double-buffered f32 in/out row
    tiles + double-buffered weight/bias blocks)."""
    bytes_per_row = 2 * 4 * (W * Cin + 4 * W * Cout)                  # in + out, x2 buffers
    fixed = 2 * 4 * ((G * Cin) * (4 * G * Cout) + 4 * G * Cout)       # weight + bias, x2
    budget = max(cfg["tile_budget"] - fixed, 1 * _MIB)
    tr = budget // max(bytes_per_row, 1)
    tr = max(8, min(int(tr), 4096))
    tr = (tr // 8) * 8
    if tr >= R:
        if cfg["two_tc"]:
            # v7x: keep >= 4 grid steps (2 per TensorCore) so each core still overlaps
            # DMA with compute; with very small R fall back to 2 / 1 steps.
            if R >= 32:
                tr = max(8, (R // 4) // 8 * 8)
            elif R >= 16:
                tr = max(8, (R // 2) // 8 * 8)
            else:
                tr = R
        else:
            # v5e/v6e: single TensorCore -> splitting buys nothing, run one big step.
            tr = R
    return min(tr, R)


def _build_group_weight(weight, bias, G):
    """Block-structured deconv weight for a group of G adjacent pixels.

    Returns w_big: (G*Cin, 4*G*Cout) with columns ordered (kh, pixel, kw, oc) — pixel p's
    (Cin, 2*Cout) kh=0 block sits at columns [p*2*Cout, (p+1)*2*Cout) and its kh=1 block
    at [2*G*Cout + p*2*Cout, ...) — and b_big: (1, 4*G*Cout) bias tiled to match.
    """
    Cin, Cout = weight.shape[0], weight.shape[1]
    two = 2 * Cout
    # Per-pixel weight with columns ordered (kh, kw, oc).
    wk = jnp.transpose(weight, (0, 2, 3, 1)).reshape(Cin, 2, two)      # (Cin, kh, 2*Cout)
    eye = jnp.eye(G, dtype=weight.dtype)
    # (p, c, kh, g, 2*Cout), nonzero only where p == g  -> block-diagonal over pixels.
    big = jnp.einsum("ckt,pg->pckgt", wk, eye)
    w_big = big.reshape(G * Cin, 4 * G * Cout)
    b_big = jnp.tile(bias, 4 * G).reshape(1, 4 * G * Cout)
    return w_big, b_big


def _upsample_kernel(x_ref, w_ref, b_ref, o_ref, *, n_groups, gk, gn_half):
    """One grid step: `tr` input image rows -> `tr` pairs of output image rows.

    x_ref : (tr, W*Cin)       lane-dense input rows (pixel-major, channel-minor)
    w_ref : (gk, 2*gn_half)   block-structured group weight (gk = G*Cin, gn_half = 2*G*Cout)
    b_ref : (1, 2*gn_half)    bias tiled to match the weight columns
    o_ref : (tr, 4*W*Cout)    [ kh=0 output image row | kh=1 output image row ],
                              each ordered (2w+kw, oc)
    """
    wmat = w_ref[...]
    tr = o_ref.shape[0]
    gn = 2 * gn_half
    # Hoist the bias broadcast out of the group loop (JAX does not CSE broadcast_in_dim).
    bb = jnp.broadcast_to(b_ref[...], (tr, gn))

    if n_groups == 1:
        # One MXU matmul + one full-width unmasked store for the whole tile.
        y = jnp.dot(x_ref[...], wmat, preferred_element_type=jnp.float32)
        o_ref[...] = (y + bb).astype(o_ref.dtype)
    else:
        half = o_ref.shape[1] // 2
        for g in range(n_groups):                     # small, static -> unrolled
            xg = x_ref[:, g * gk:(g + 1) * gk]        # (tr, G*Cin), lane-aligned slice
            y = jnp.dot(xg, wmat, preferred_element_type=jnp.float32) + bb
            y = y.astype(o_ref.dtype)
            o_ref[:, g * gn_half:(g + 1) * gn_half] = y[:, :gn_half]            # kh = 0
            o_ref[:, half + g * gn_half:half + (g + 1) * gn_half] = y[:, gn_half:]  # kh = 1


@jax.jit
def upsample_pallas(x, weight, bias):
    """x: (B, L, Cin); weight: (Cin, Cout, 2, 2) (PyTorch ConvTranspose2d layout);
    bias: (Cout,).  Returns (B, 4L, Cout) matching the PyTorch Upsample module."""
    B, L, Cin = x.shape
    H = round(math.sqrt(L))
    W = H
    assert H * W == L, "L must be a perfect square"
    Cout = weight.shape[1]

    cfg = _chip_config()
    G = _pick_group(W, Cin, Cout, cfg["target_k"])
    n_groups = W // G

    R = B * H                  # number of input image rows
    N_in = W * Cin             # one input image row, flattened
    N_out = 4 * W * Cout       # two output image rows, flattened

    wg, bg = _build_group_weight(weight, bias, G)
    x_rows = x.reshape(R, N_in)                      # zero-cost view

    tr = _pick_tile_rows(R, W, Cin, Cout, G, cfg)
    grid = (pl.cdiv(R, tr),)

    M = B * L
    cost = pl.CostEstimate(
        flops=2 * M * Cin * 4 * G * Cout,
        transcendentals=0,
        bytes_accessed=4 * (M * Cin + M * 4 * Cout + wg.size + bg.size),
    )

    kernel = functools.partial(
        _upsample_kernel, n_groups=n_groups, gk=G * Cin, gn_half=2 * G * Cout
    )

    y_rows = pl.pallas_call(
        kernel,
        out_shape=jax.ShapeDtypeStruct((R, N_out), x.dtype),
        grid=grid,
        in_specs=[
            pl.BlockSpec((tr, N_in), lambda i: (i, 0)),
            pl.BlockSpec((G * Cin, 4 * G * Cout), lambda i: (0, 0)),
            pl.BlockSpec((1, 4 * G * Cout), lambda i: (0, 0)),
        ],
        out_specs=pl.BlockSpec((tr, N_out), lambda i: (i, 0)),
        compiler_params=pltpu.CompilerParams(
            dimension_semantics=("parallel",),
            vmem_limit_bytes=cfg["vmem_limit"],
        ),
        cost_estimate=cost,
    )(x_rows, wg, bg)

    # (R, 4*W*Cout) already carries elements in [b, 2h+kh, 2w+kw, oc] row-major order,
    # so this reshape is a pure (zero-cost) view.
    return y_rows.reshape(B, 4 * L, Cout)


def upsample_reference(x, weight, bias):
    """Pure-JAX reference matching nn.ConvTranspose2d(k=2, s=2) semantics."""
    B, L, Cin = x.shape
    H = round(math.sqrt(L))
    Cout = weight.shape[1]
    x_img = x.reshape(B, H, H, Cin)                              # x[b, h*W+w, c]
    y6 = jnp.einsum("bhwc,cokl->bhkwlo", x_img, weight) + bias
    return y6.reshape(B, 4 * L, Cout)


if __name__ == "__main__":
    key = jax.random.PRNGKey(0)
    kx, kw, kb = jax.random.split(key, 3)

    B = 2
    H = W = 8
    L = H * W                  # 64 tokens
    in_channel = 32
    out_channel = 16

    x = jax.random.normal(kx, (B, L, in_channel), dtype=jnp.float32)
    # ConvTranspose2d weight shape: (Cin, Cout, 2, 2)
    fan = in_channel * 4
    bound = 1.0 / math.sqrt(fan)
    weight = jax.random.uniform(
        kw, (in_channel, out_channel, 2, 2), dtype=jnp.float32, minval=-bound, maxval=bound
    )
    bias = jax.random.uniform(
        kb, (out_channel,), dtype=jnp.float32, minval=-bound, maxval=bound
    )

    out = upsample_pallas(x, weight, bias)
    out = jax.block_until_ready(out)

    ref = upsample_reference(x, weight, bias)
    assert out.shape == (B, 4 * L, out_channel), out.shape
    assert jnp.allclose(out, ref, atol=1e-4, rtol=1e-4), "mismatch vs reference"

    print("KERNEL_OK")
</pallas_src>

<mosaic_0001>
module attributes {stable_mosaic.version = 11 : i64} {
  func.func @_upsample_kernel(%arg0: i32, %arg1: memref<8x256xf32, #tpu.memory_space<vmem>>, %arg2: memref<256x512xf32, #tpu.memory_space<vmem>>, %arg3: memref<1x512xf32, #tpu.memory_space<vmem>>, %arg4: memref<8x512xf32, #tpu.memory_space<vmem>>) attributes {dimension_semantics = [#tpu.dimension_semantics<parallel>], iteration_bounds = array<i64: 2>, scalar_prefetch = 0 : i64, scratch_operands = 0 : i64, tpu.core_type = #tpu.core_type<tc>, window_params = [{transform_indices = @transform_0, window_bounds = array<i64: 8, 256>}, {pipeline_mode = #tpu.pipeline_mode<synchronous>, transform_indices = @transform_1, window_bounds = array<i64: 256, 512>}, {pipeline_mode = #tpu.pipeline_mode<synchronous>, transform_indices = @transform_2, window_bounds = array<i64: 1, 512>}, {transform_indices = @transform_3, window_bounds = array<i64: 8, 512>}]} {
    %c0 = arith.constant 0 : index
    %c0_0 = arith.constant 0 : index
    %0 = vector.load %arg2[%c0, %c0_0] : memref<256x512xf32, #tpu.memory_space<vmem>>, vector<256x512xf32>
    %c0_1 = arith.constant 0 : index
    %c0_2 = arith.constant 0 : index
    %1 = vector.load %arg3[%c0_1, %c0_2] : memref<1x512xf32, #tpu.memory_space<vmem>>, vector<1x512xf32>
    %2 = vector.shape_cast %1 : vector<1x512xf32> to vector<1x512xf32>
    %3 = vector.broadcast %2 : vector<1x512xf32> to vector<8x512xf32>
    %c0_3 = arith.constant 0 : index
    %c0_4 = arith.constant 0 : index
    %4 = vector.load %arg1[%c0_3, %c0_4] : memref<8x256xf32, #tpu.memory_space<vmem>>, vector<8x256xf32>
    %cst = arith.constant dense<0.000000e+00> : vector<8x512xf32>
    %5 = tpu.matmul %4, %0, %cst {dimension_numbers = #tpu.dot_dimension_numbers<[1], [0], [0], [1], [0, 0, 1, 1], [], []>} : vector<8x256xf32>, vector<256x512xf32>, vector<8x512xf32> -> vector<8x512xf32>
    %6 = arith.addf %5, %3 : vector<8x512xf32>
    %c0_5 = arith.constant 0 : index
    %c0_6 = arith.constant 0 : index
    %7 = vector.load %arg4[%c0_5, %c0_6] : memref<8x512xf32, #tpu.memory_space<vmem>>, vector<8x512xf32>
    tpu.vector_store %arg4[%c0_5, %c0_6], %6 {strides = array<i32>} : memref<8x512xf32, #tpu.memory_space<vmem>>, vector<8x512xf32>,
    return
  }
  func.func @transform_0(%arg0: i32) -> (i32, i32) {
    %c0_i32 = arith.constant 0 : i32
    %c0_i32_0 = arith.constant 0 : i32
    return %arg0, %c0_i32 : i32, i32
  }
  func.func @transform_1(%arg0: i32) -> (i32, i32) {
    %c0_i32 = arith.constant 0 : i32
    %c0_i32_0 = arith.constant 0 : i32
    %c0_i32_1 = arith.constant 0 : i32
    return %c0_i32, %c0_i32_0 : i32, i32
  }
  func.func @transform_2(%arg0: i32) -> (i32, i32) {
    %c0_i32 = arith.constant 0 : i32
    %c0_i32_0 = arith.constant 0 : i32
    %c0_i32_1 = arith.constant 0 : i32
    return %c0_i32, %c0_i32_0 : i32, i32
  }
  func.func @transform_3(%arg0: i32) -> (i32, i32) {
    %c0_i32 = arith.constant 0 : i32
    %c0_i32_0 = arith.constant 0 : i32
    return %arg0, %c0_i32 : i32, i32
  }
}

</mosaic_0001>

<bundles_post_ra>
// kernel: tile.8
= control target key start
LH: loop header
LB: loop body
LE: loop exit
PB: predicated region body
PF: predicated region fallthrough
CT: control target
= control target key end

     0   :  { %s40_s0 = inlined_call_operand.vmem [shape: f32[16], index: 0, kind: input, shape index: {}]   ;;  %s41_s1 = inlined_call_operand.vmem [shape: f32[32,16], index: 1, kind: output, shape index: {}]  }
   0x1   :  { %v4_v0 = vld [vmem:[%s40_s0] ss:$0 sm:$0xff] }
   0x2   :  { %5 = vst [vmem:[%s41_s1] sm:$0xff] %v4_v0  ;;  %12 = vst [vmem:[%s41_s1 + $0x8] sm:$0xff] %v4_v0 }
   0x3   :  { %13 = vst [vmem:[%s41_s1 + $0x10] sm:$0xff] %v4_v0  ;;  %14 = vst [vmem:[%s41_s1 + $0x18] sm:$0xff] %v4_v0 }

// kernel: tile.9
= control target key start
LH: loop header
LB: loop body
LE: loop exit
PB: predicated region body
PF: predicated region fallthrough
CT: control target
= control target key end

     0   :  { %s89_s8 = smov 112   ;;  %s90_s11 = smov 80   ;;  %vm3_vm0 = vcmask 130048   ;;  %vm9_vm1 = vcmask 1048448   ;;  %vm15_vm2 = vcmask 917248   ;;  %vm21_vm3 = vcmask 786048   ;;  %s142_s0 = inlined_call_operand.vmem [shape: f32[32,16], index: 0, kind: input, shape index: {}]   ;;  %s143_s1 = inlined_call_operand.vmem [shape: f32[1,512], index: 1, kind: output, shape index: {}]  }
   0x1   :  { %v72_v0 = vld [vmem:[%s142_s0 + $0x7] ss:$8 sm:$0xf]   ;;  %v74_v1 = vld [vmem:[%s142_s0 + $0x5] ss:$8 sm:$0xf]  }
   0x2   :  { %7 = vrot.lane.b32.xlu0 %v72_v0, %s89_s8  ;;  %19 = vrot.lane.b32.xlu1 %v74_v1, %s90_s11  ;;  %v73_v2 = vld [vmem:[%s142_s0 + $0x6] ss:$8 sm:$0xf]   ;;  %v75_v3 = vld [vmem:[%s142_s0 + $0x4] ss:$8 sm:$0xf]  }
   0x3   :  { %s91_s16 = smov 96   ;;  %v2_v4 = vld [vmem:[%s142_s0] ss:$8 sm:$0xf]   ;;  %s92_s19 = smov 64   ;;  %vm27_vm4 = vcmask 654848  }
   0x4   :  { %v76_v5 = vld [vmem:[%s142_s0 + $0x3] ss:$8 sm:$0xf]   ;;  %4 = vst.msk [vmem:[#allocation0] ss:$8 sm:$0xf] %vm3_vm0, %v2_v4  }
   0x5   :  { %v77_v6 = vld [vmem:[%s142_s0 + $0x2] ss:$8 sm:$0xf]   ;;  %s93_s24 = smov 48   ;;  %s94_s25 = smov 32   ;;  %vm33_vm5 = vcmask 523648  }
   0x6   :  { %13 = vrot.lane.b32.xlu0 %v73_v2, %s91_s16  ;;  %25 = vrot.lane.b32.xlu1 %v75_v3, %s92_s19  ;;  %v78_v7 = vld [vmem:[%s142_s0 + $0x1] ss:$8 sm:$0xf]   ;;  %s95_s0 = smov 16   ;;  %vm39_vm6 = vcmask 392448   ;;  %vm45_vm7 = vcmask 261248  }
   0xa   :  { %31 = vrot.lane.b32.xlu0 %v76_v5, %s93_s24  ;;  %37 = vrot.lane.b32.xlu1 %v77_v6, %s94_s25 }
   0xe   :  { %43 = vrot.lane.b32.xlu0 %v78_v7, %s95_s0 }
  0x74   :  { %v8_v8 = vpop.permute.xlu0 %7   ;;  %v20_v9 = vpop.permute.xlu1 %19  }
  0x75   :  { %10 = vst.msk [vmem:[#allocation0] ss:$8 sm:$0xf] %vm9_vm1, %v8_v8  }
  0x78   :  { %v14_v10 = vpop.permute.xlu0 %13   ;;  %v26_v11 = vpop.permute.xlu1 %25  }
  0x79   :  { %16 = vst.msk [vmem:[#allocation0] ss:$8 sm:$0xf] %vm15_vm2, %v14_v10  }
  0x7a   :  { %22 = vst.msk [vmem:[#allocation0] ss:$8 sm:$0xf] %vm21_vm3, %v20_v9  }
  0x7b   :  { %28 = vst.msk [vmem:[#allocation0] ss:$8 sm:$0xf] %vm27_vm4, %v26_v11  }
  0x7c   :  { %v32_v12 = vpop.permute.xlu0 %31   ;;  %v38_v13 = vpop.permute.xlu1 %37  }
  0x7d   :  { %34 = vst.msk [vmem:[#allocation0] ss:$8 sm:$0xf] %vm33_vm5, %v32_v12  }
  0x7e   :  { %40 = vst.msk [vmem:[#allocation0] ss:$8 sm:$0xf] %vm39_vm6, %v38_v13  }
  0x80   :  { %v44_v14 = vpop.permute.xlu0 %43  }
  0x81   :  { %46 = vst.msk [vmem:[#allocation0] ss:$8 sm:$0xf] %vm45_vm7, %v44_v14  }
  0x88   :  { %v50_v15 = vld [vmem:[#allocation0] sm:$0x1]  ;;  %v54_v16 = vld [vmem:[#allocation0 + $0x8] sm:$0x1]  ;;  %v59_v17 = vld [vmem:[#allocation0 + $0x10] sm:$0x1] }
  0x89   :  { %52 = vst [vmem:[%s143_s1] sm:$0x1] %v50_v15  ;;  %79 = vst [vmem:[%s143_s1 + $0x1] sm:$0x1] %v54_v16  ;;  %v65_v18 = vld [vmem:[#allocation0 + $0x18] sm:$0x1] }
  0x8a   :  { %80 = vst [vmem:[%s143_s1 + $0x2] sm:$0x1] %v59_v17  ;;  %81 = vst [vmem:[%s143_s1 + $0x3] sm:$0x1] %v65_v18 }

// kernel: upsample_pallas.1
= control target key start
LH: loop header
LB: loop body
LE: loop exit
PB: predicated region body
PF: predicated region fallthrough
CT: control target
= control target key end

     0   :  { %s701_s12 = smov 0   ;;  %s1123_s0 = inlined_call_operand.vmem [shape: f32[16,256], index: 0, kind: input, shape index: {}]   ;;  %s1124_s1 = inlined_call_operand.vmem [shape: f32[256,512], index: 1, kind: input, shape index: {}]   ;;  %s1125_s2 = inlined_call_operand.vmem [shape: f32[1,512], index: 2, kind: input, shape index: {}]   ;;  %s1126_s3 = inlined_call_operand.vmem [shape: f32[16,512], index: 3, kind: output, shape index: {}]  }
   0x1 LB: > { %s524_s13 = sadd.s32 4294967295, %s679_s12   ;;  %p528_p0 = scmp.ge.s32.totalorder %s679_s12, 1  ;;  %s679_s12 = sphi %s701_s12, %s13_s12  }
   0x2   : > { %p137_p1 = scmp.lt.s32.totalorder %s679_s12, 3 }
   0x4   : > { %p138_p2 = pnand %p528_p0, %p137_p1 }
   0x5   : > { %v172_v0 = vld [vmem:[%s1124_s1 + $0x8] sm:$0xff] (!%p138_p2)  ;;  %v174_v2 = vld [vmem:[%s1124_s1 + $0x18] sm:$0xff] (!%p138_p2)  ;;  %v171_v5 = vld [vmem:[%s1124_s1] sm:$0xff] (!%p138_p2)  ;;  %p915_p3 = scmp.lt.s32.totalorder (!%p138_p2), %s524_s13, 1 }
   0x6   : > { %141 = sbr.rel (%p138_p2) target bundleno = 290 (0x122), region = 32  ;;  %v176_v1 = vld [vmem:[%s1124_s1 + $0x28] sm:$0xff] (!%p138_p2)  ;;  %v178_v4 = vld [vmem:[%s1124_s1 + $0x38] sm:$0xff] (!%p138_p2)  ;;  %v175_v6 = vld [vmem:[%s1124_s1 + $0x20] sm:$0xff] (!%p138_p2) }
   0x7   : > { %v537_v3 = vpack.c.bf16 (!%p138_p2), %v176_v1, %v172_v0  ;;  %v601_v7 = vpack.c.bf16 (!%p138_p2), %v178_v4, %v174_v2  ;;  %v539_v8 = vpack.c.bf16 (!%p138_p2), %v175_v6, %v171_v5  ;;  %v173_v9 = vld [vmem:[%s1124_s1 + $0x10] sm:$0xff] (!%p138_p2)  ;;  %v180_v11 = vld [vmem:[%s1124_s1 + $0x48] sm:$0xff] (!%p138_p2)  ;;  %v182_v14 = vld [vmem:[%s1124_s1 + $0x58] sm:$0xff] (!%p138_p2) }
   0x8   : > { %v177_v10 = vld [vmem:[%s1124_s1 + $0x30] sm:$0xff] (!%p138_p2)  ;;  %v184_v13 = vld [vmem:[%s1124_s1 + $0x68] sm:$0xff] (!%p138_p2)  ;;  %v186_v15 = vld [vmem:[%s1124_s1 + $0x78] sm:$0xff] (!%p138_p2) }
   0x9   : > { %538 = vmatprep.subr.bf16.mxu0 (!%p138_p2), %v537_v3  ;;  %v603_v12 = vpack.c.bf16 (!%p138_p2), %v177_v10, %v173_v9  ;;  %602 = vmatprep.subr.bf16.mxu1 (!%p138_p2), %v601_v7  ;;  %v541_v16 = vpack.c.bf16 (!%p138_p2), %v184_v13, %v180_v11  ;;  %v605_v17 = vpack.c.bf16 (!%p138_p2), %v186_v15, %v182_v14  ;;  %v179_v18 = vld [vmem:[%s1124_s1 + $0x40] sm:$0xff] (!%p138_p2)  ;;  %v181_v20 = vld [vmem:[%s1124_s1 + $0x50] sm:$0xff] (!%p138_p2)  ;;  %v188_v23 = vld [vmem:[%s1124_s1 + $0x88] sm:$0xff] (!%p138_p2) }
   0xa   : > { %540 = vmatpush1.bf16.msra.mxu0 (!%p138_p2), %v539_v8  ;;  %v183_v19 = vld [vmem:[%s1124_s1 + $0x60] sm:$0xff] (!%p138_p2)  ;;  %v185_v22 = vld [vmem:[%s1124_s1 + $0x70] sm:$0xff] (!%p138_p2)  ;;  %v192_v24 = vld [vmem:[%s1124_s1 + $0xa8] sm:$0xff] (!%p138_p2) }
   0xb   : > { %604 = vmatpush1.bf16.msra.mxu1 (!%p138_p2), %v603_v12  ;;  %v543_v21 = vpack.c.bf16 (!%p138_p2), %v183_v19, %v179_v18  ;;  %542 = vmatprep.subr.bf16.mxu0 (!%p138_p2), %v541_v16  ;;  %v607_v25 = vpack.c.bf16 (!%p138_p2), %v185_v22, %v181_v20  ;;  %v545_v26 = vpack.c.bf16 (!%p138_p2), %v192_v24, %v188_v23  ;;  %v190_v27 = vld [vmem:[%s1124_s1 + $0x98] sm:$0xff] (!%p138_p2)  ;;  %v187_v29 = vld [vmem:[%s1124_s1 + $0x80] sm:$0xff] (!%p138_p2)  ;;  %v189_v32 = vld [vmem:[%s1124_s1 + $0x90] sm:$0xff] (!%p138_p2) }
   0xc   : > { %606 = vmatprep.subr.bf16.mxu1 (!%p138_p2), %v605_v17  ;;  %v194_v28 = vld [vmem:[%s1124_s1 + $0xb8] sm:$0xff] (!%p138_p2)  ;;  %v191_v31 = vld [vmem:[%s1124_s1 + $0xa0] sm:$0xff] (!%p138_p2)  ;;  %v193_v33 = vld [vmem:[%s1124_s1 + $0xb0] sm:$0xff] (!%p138_p2) }
   0xd   : > { %v609_v30 = vpack.c.bf16 %v194_v28, %v190_v27  ;;  %v547_v34 = vpack.c.bf16 %v191_v31, %v187_v29  ;;  %v196_v35 = vld [vmem:[%s1124_s1 + $0xc8] sm:$0xff]  ;;  %v198_v37 = vld [vmem:[%s1124_s1 + $0xd8] sm:$0xff]  ;;  %v611_v38 = vpack.c.bf16 %v193_v33, %v189_v32  ;;  %v195_v41 = vld [vmem:[%s1124_s1 + $0xc0] sm:$0xff]  ;;  %s1129_s13 = smov (!%p915_p3, %s524_s13), 1 }
   0xe   : > { %544 = vmatpush1.bf16.msra.mxu0 %v543_v21  ;;  %v200_v36 = vld [vmem:[%s1124_s1 + $0xe8] sm:$0xff]  ;;  %v202_v40 = vld [vmem:[%s1124_s1 + $0xf8] sm:$0xff]  ;;  %v199_v42 = vld [vmem:[%s1124_s1 + $0xe0] sm:$0xff]  ;;  %s535_s6 = sshll.u32 %s1129_s13, 4  ;;  %s536_s30 = sshll.u32 %s1129_s13, 5 }
   0xf   : > { %608 = vmatpush1.bf16.msra.mxu1 %v607_v25  ;;  %546 = vmatprep.subr.bf16.mxu0 %v545_v26  ;;  %v549_v39 = vpack.c.bf16 %v200_v36, %v196_v35  ;;  %v613_v43 = vpack.c.bf16 %v202_v40, %v198_v37  ;;  %v197_v44 = vld [vmem:[%s1124_s1 + $0xd0] sm:$0xff]  ;;  %v204_v46 = vld [vmem:[%s1124_s1 + $0x108] sm:$0xff]  ;;  %v206_v48 = vld [vmem:[%s1124_s1 + $0x118] sm:$0xff]  ;;  %v551_v50 = vpack.c.bf16 %v199_v42, %v195_v41  ;;  %s1001_s27 = scalar_lea.vmem %s1123_s0, %s535_s6  ;;  %s170_s5 = scalar_lea.vmem %s1126_s3, %s536_s30 }
  0x10   : > { %610 = vmatprep.subr.bf16.mxu1 %v609_v30  ;;  %v201_v45 = vld [vmem:[%s1124_s1 + $0xf0] sm:$0xff]  ;;  %v208_v47 = vld [vmem:[%s1124_s1 + $0x128] sm:$0xff]  ;;  %v210_v49 = vld [vmem:[%s1124_s1 + $0x138] sm:$0xff] }
  0x11   : > { %v615_v51 = vpack.c.bf16 %v201_v45, %v197_v44  ;;  %v553_v52 = vpack.c.bf16 %v208_v47, %v204_v46  ;;  %v203_v53 = vld [vmem:[%s1124_s1 + $0x100] sm:$0xff]  ;;  %v205_v55 = vld [vmem:[%s1124_s1 + $0x110] sm:$0xff]  ;;  %v617_v56 = vpack.c.bf16 %v210_v49, %v206_v48  ;;  %v212_v58 = vld [vmem:[%s1124_s1 + $0x148] sm:$0xff] }
  0x12   : > { %548 = vmatpush1.bf16.msra.mxu0 %v547_v34  ;;  %v207_v54 = vld [vmem:[%s1124_s1 + $0x120] sm:$0xff]  ;;  %v209_v57 = vld [vmem:[%s1124_s1 + $0x130] sm:$0xff]  ;;  %v216_v59 = vld [vmem:[%s1124_s1 + $0x168] sm:$0xff] }
  0x13   : > { %612 = vmatpush1.bf16.msra.mxu1 %v611_v38  ;;  %550 = vmatprep.subr.bf16.mxu0 %v549_v39  ;;  %v214_v60 = vld [vmem:[%s1124_s1 + $0x158] sm:$0xff]  ;;  %v555_v62 = vpack.c.bf16 %v207_v54, %v203_v53  ;;  %v619_v63 = vpack.c.bf16 %v209_v57, %v205_v55  ;;  %v557_v0 = vpack.c.bf16 %v216_v59, %v212_v58  ;;  %v211_v1 = vld [vmem:[%s1124_s1 + $0x140] sm:$0xff]  ;;  %v213_v3 = vld [vmem:[%s1124_s1 + $0x150] sm:$0xff] }
  0x14   : > { %614 = vmatprep.subr.bf16.mxu1 %v613_v43  ;;  %v218_v61 = vld [vmem:[%s1124_s1 + $0x178] sm:$0xff]  ;;  %v215_v2 = vld [vmem:[%s1124_s1 + $0x160] sm:$0xff]  ;;  %v217_v5 = vld [vmem:[%s1124_s1 + $0x170] sm:$0xff] }
  0x15   : > { %v621_v4 = vpack.c.bf16 %v218_v61, %v214_v60  ;;  %v220_v6 = vld [vmem:[%s1124_s1 + $0x188] sm:$0xff]  ;;  %v222_v8 = vld [vmem:[%s1124_s1 + $0x198] sm:$0xff]  ;;  %v559_v10 = vpack.c.bf16 %v215_v2, %v211_v1  ;;  %v623_v11 = vpack.c.bf16 %v217_v5, %v213_v3  ;;  %v219_v13 = vld [vmem:[%s1124_s1 + $0x180] sm:$0xff] }
  0x16   : > { %552 = vmatpush1.bf16.msra.mxu0 %v551_v50  ;;  %v224_v7 = vld [vmem:[%s1124_s1 + $0x1a8] sm:$0xff]  ;;  %v226_v9 = vld [vmem:[%s1124_s1 + $0x1b8] sm:$0xff]  ;;  %v223_v14 = vld [vmem:[%s1124_s1 + $0x1a0] sm:$0xff] }
  0x17   : > { %616 = vmatpush1.bf16.msra.mxu1 %v615_v51  ;;  %554 = vmatprep.subr.bf16.mxu0 %v553_v52  ;;  %v561_v12 = vpack.c.bf16 %v224_v7, %v220_v6  ;;  %v221_v15 = vld [vmem:[%s1124_s1 + $0x190] sm:$0xff]  ;;  %v625_v16 = vpack.c.bf16 %v226_v9, %v222_v8  ;;  %v228_v18 = vld [vmem:[%s1124_s1 + $0x1c8] sm:$0xff]  ;;  %v230_v20 = vld [vmem:[%s1124_s1 + $0x1d8] sm:$0xff]  ;;  %v563_v22 = vpack.c.bf16 %v223_v14, %v219_v13 }
  0x18   : > { %618 = vmatprep.subr.bf16.mxu1 %v617_v56  ;;  %v225_v17 = vld [vmem:[%s1124_s1 + $0x1b0] sm:$0xff]  ;;  %v232_v19 = vld [vmem:[%s1124_s1 + $0x1e8] sm:$0xff]  ;;  %v234_v21 = vld [vmem:[%s1124_s1 + $0x1f8] sm:$0xff] }
  0x19   : > { %v627_v23 = vpack.c.bf16 %v225_v17, %v221_v15  ;;  %v565_v24 = vpack.c.bf16 %v232_v19, %v228_v18  ;;  %v227_v25 = vld [vmem:[%s1124_s1 + $0x1c0] sm:$0xff]  ;;  %v229_v27 = vld [vmem:[%s1124_s1 + $0x1d0] sm:$0xff]  ;;  %v629_v28 = vpack.c.bf16 %v234_v21, %v230_v20  ;;  %v236_v30 = vld [vmem:[%s1124_s1 + $0x208] sm:$0xff] }
  0x1a   : > { %556 = vmatpush1.bf16.msra.mxu0 %v555_v62  ;;  %v231_v26 = vld [vmem:[%s1124_s1 + $0x1e0] sm:$0xff]  ;;  %v233_v29 = vld [vmem:[%s1124_s1 + $0x1f0] sm:$0xff]  ;;  %v240_v31 = vld [vmem:[%s1124_s1 + $0x228] sm:$0xff] }
  0x1b   : > { %620 = vmatpush1.bf16.msra.mxu1 %v619_v63  ;;  %558 = vmatprep.subr.bf16.mxu0 %v557_v0  ;;  %v238_v32 = vld [vmem:[%s1124_s1 + $0x218] sm:$0xff]  ;;  %v567_v34 = vpack.c.bf16 %v231_v26, %v227_v25  ;;  %v631_v35 = vpack.c.bf16 %v233_v29, %v229_v27  ;;  %v569_v36 = vpack.c.bf16 %v240_v31, %v236_v30  ;;  %v235_v37 = vld [vmem:[%s1124_s1 + $0x200] sm:$0xff]  ;;  %v237_v39 = vld [vmem:[%s1124_s1 + $0x210] sm:$0xff] }
  0x1c   : > { %622 = vmatprep.subr.bf16.mxu1 %v621_v4  ;;  %v242_v33 = vld [vmem:[%s1124_s1 + $0x238] sm:$0xff]  ;;  %v239_v38 = vld [vmem:[%s1124_s1 + $0x220] sm:$0xff]  ;;  %v241_v41 = vld [vmem:[%s1124_s1 + $0x230] sm:$0xff] }
  0x1d   : > { %v633_v40 = vpack.c.bf16 %v242_v33, %v238_v32  ;;  %v244_v42 = vld [vmem:[%s1124_s1 + $0x248] sm:$0xff]  ;;  %v246_v44 = vld [vmem:[%s1124_s1 + $0x258] sm:$0xff]  ;;  %v571_v46 = vpack.c.bf16 %v239_v38, %v235_v37  ;;  %v635_v47 = vpack.c.bf16 %v241_v41, %v237_v39  ;;  %v243_v49 = vld [vmem:[%s1124_s1 + $0x240] sm:$0xff] }
  0x1e   : > { %560 = vmatpush1.bf16.msra.mxu0 %v559_v10  ;;  %v248_v43 = vld [vmem:[%s1124_s1 + $0x268] sm:$0xff]  ;;  %v250_v45 = vld [vmem:[%s1124_s1 + $0x278] sm:$0xff]  ;;  %v247_v50 = vld [vmem:[%s1124_s1 + $0x260] sm:$0xff] }
  0x1f   : > { %624 = vmatpush1.bf16.msra.mxu1 %v623_v11  ;;  %562 = vmatprep.subr.bf16.mxu0 %v561_v12  ;;  %v573_v48 = vpack.c.bf16 %v248_v43, %v244_v42  ;;  %v245_v51 = vld [vmem:[%s1124_s1 + $0x250] sm:$0xff]  ;;  %v637_v52 = vpack.c.bf16 %v250_v45, %v246_v44  ;;  %v252_v54 = vld [vmem:[%s1124_s1 + $0x288] sm:$0xff]  ;;  %v254_v56 = vld [vmem:[%s1124_s1 + $0x298] sm:$0xff]  ;;  %v575_v58 = vpack.c.bf16 %v247_v50, %v243_v49 }
  0x20   : > { %626 = vmatprep.subr.bf16.mxu1 %v625_v16  ;;  %v249_v53 = vld [vmem:[%s1124_s1 + $0x270] sm:$0xff]  ;;  %v256_v55 = vld [vmem:[%s1124_s1 + $0x2a8] sm:$0xff]  ;;  %v258_v57 = vld [vmem:[%s1124_s1 + $0x2b8] sm:$0xff] }
  0x21   : > { %v639_v59 = vpack.c.bf16 %v249_v53, %v245_v51  ;;  %v577_v60 = vpack.c.bf16 %v256_v55, %v252_v54  ;;  %v251_v61 = vld [vmem:[%s1124_s1 + $0x280] sm:$0xff]  ;;  %v253_v63 = vld [vmem:[%s1124_s1 + $0x290] sm:$0xff]  ;;  %v641_v0 = vpack.c.bf16 %v258_v57, %v254_v56  ;;  %v260_v2 = vld [vmem:[%s1124_s1 + $0x2c8] sm:$0xff] }
  0x22   : > { %564 = vmatpush1.bf16.msra.mxu0 %v563_v22  ;;  %v255_v62 = vld [vmem:[%s1124_s1 + $0x2a0] sm:$0xff]  ;;  %v257_v1 = vld [vmem:[%s1124_s1 + $0x2b0] sm:$0xff]  ;;  %v264_v3 = vld [vmem:[%s1124_s1 + $0x2e8] sm:$0xff] }
  0x23   : > { %628 = vmatpush1.bf16.msra.mxu1 %v627_v23  ;;  %566 = vmatprep.subr.bf16.mxu0 %v565_v24  ;;  %v262_v4 = vld [vmem:[%s1124_s1 + $0x2d8] sm:$0xff]  ;;  %v579_v6 = vpack.c.bf16 %v255_v62, %v251_v61  ;;  %v259_v7 = vld [vmem:[%s1124_s1 + $0x2c0] sm:$0xff]  ;;  %v643_v8 = vpack.c.bf16 %v257_v1, %v253_v63  ;;  %v581_v9 = vpack.c.bf16 %v264_v3, %v260_v2  ;;  %v261_v11 = vld [vmem:[%s1124_s1 + $0x2d0] sm:$0xff]  ;;  %v301_v2 = vlaneseq }
  0x24   : > { %630 = vmatprep.subr.bf16.mxu1 %v629_v28  ;;  %v266_v5 = vld [vmem:[%s1124_s1 + $0x2f8] sm:$0xff]  ;;  %v263_v10 = vld [vmem:[%s1124_s1 + $0x2e0] sm:$0xff]  ;;  %v265_v12 = vld [vmem:[%s1124_s1 + $0x2f0] sm:$0xff] }
  0x25   : > { %v645_v13 = vpack.c.bf16 %v266_v5, %v262_v4  ;;  %v268_v14 = vld [vmem:[%s1124_s1 + $0x308] sm:$0xff]  ;;  %v270_v17 = vld [vmem:[%s1124_s1 + $0x318] sm:$0xff]  ;;  %v583_v19 = vpack.c.bf16 %v263_v10, %v259_v7  ;;  %v647_v20 = vpack.c.bf16 %v265_v12, %v261_v11  ;;  %v267_v22 = vld [vmem:[%s1124_s1 + $0x300] sm:$0xff]  ;;  %v302_v3 = vshrl.u32 %v301_v2, 7 }
  0x26   : > { %568 = vmatpush1.bf16.msra.mxu0 %v567_v34  ;;  %v272_v15 = vld [vmem:[%s1124_s1 + $0x328] sm:$0xff]  ;;  %v274_v18 = vld [vmem:[%s1124_s1 + $0x338] sm:$0xff]  ;;  %v271_v23 = vld [vmem:[%s1124_s1 + $0x320] sm:$0xff] }
  0x27   : > { %632 = vmatpush1.bf16.msra.mxu1 %v631_v35  ;;  %570 = vmatprep.subr.bf16.mxu0 %v569_v36  ;;  %v322_v16 = vld [vmem:[%s1001_s27 + $0x8] sm:$0xff]  ;;  %v585_v21 = vpack.c.bf16 %v272_v15, %v268_v14  ;;  %v269_v24 = vld [vmem:[%s1124_s1 + $0x310] sm:$0xff]  ;;  %v649_v25 = vpack.c.bf16 %v274_v18, %v270_v17  ;;  %v278_v29 = vld [vmem:[%s1124_s1 + $0x358] sm:$0xff]  ;;  %v587_v31 = vpack.c.bf16 %v271_v23, %v267_v22  ;;  %v303_v4 = vsub.s32 0, %v302_v3 }
  0x28   : > { %634 = vmatprep.subr.bf16.mxu1 %v633_v40  ;;  %387 = vmatprep.mubr.f32.mxu0 %v322_v16  ;;  %v273_v26 = vld [vmem:[%s1124_s1 + $0x330] sm:$0xff]  ;;  %v276_v27 = vld [vmem:[%s1124_s1 + $0x348] sm:$0xff]  ;;  %v282_v30 = vld [vmem:[%s1124_s1 + $0x378] sm:$0xff]  ;;  %v307_v7 = vsub.s32 1, %v302_v3 }
  0x29   : > { %458 = vmatprep.mubr.f32.mxu1 %v322_v16  ;;  %v280_v28 = vld [vmem:[%s1124_s1 + $0x368] sm:$0xff]  ;;  %v651_v32 = vpack.c.bf16 %v273_v26, %v269_v24  ;;  %v275_v34 = vld [vmem:[%s1124_s1 + $0x340] sm:$0xff]  ;;  %v277_v36 = vld [vmem:[%s1124_s1 + $0x350] sm:$0xff]  ;;  %v653_v37 = vpack.c.bf16 %v282_v30, %v278_v29 }
  0x2a   : > { %572 = vmatpush1.bf16.msra.mxu0 %v571_v46  ;;  %v589_v33 = vpack.c.bf16 %v280_v28, %v276_v27  ;;  %v279_v35 = vld [vmem:[%s1124_s1 + $0x360] sm:$0xff]  ;;  %v281_v38 = vld [vmem:[%s1124_s1 + $0x370] sm:$0xff]  ;;  %v284_v39 = vld [vmem:[%s1124_s1 + $0x388] sm:$0xff] }
  0x2b   : > { %636 = vmatpush1.bf16.msra.mxu1 %v635_v47  ;;  %574 = vmatprep.subr.bf16.mxu0 %v573_v48  ;;  %v288_v40 = vld [vmem:[%s1124_s1 + $0x3a8] sm:$0xff]  ;;  %v286_v41 = vld [vmem:[%s1124_s1 + $0x398] sm:$0xff]  ;;  %v591_v43 = vpack.c.bf16 %v279_v35, %v275_v34  ;;  %v655_v44 = vpack.c.bf16 %v281_v38, %v277_v36  ;;  %v283_v46 = vld [vmem:[%s1124_s1 + $0x380] sm:$0xff] }
  0x2c   : > { %638 = vmatprep.subr.bf16.mxu1 %v637_v52  ;;  %v290_v42 = vld [vmem:[%s1124_s1 + $0x3b8] sm:$0xff]  ;;  %v593_v45 = vpack.c.bf16 %v288_v40, %v284_v39  ;;  %v287_v47 = vld [vmem:[%s1124_s1 + $0x3a0] sm:$0xff]  ;;  %v285_v48 = vld [vmem:[%s1124_s1 + $0x390] sm:$0xff] }
  0x2d   : > { %v657_v49 = vpack.c.bf16 %v290_v42, %v286_v41  ;;  %v289_v50 = vld [vmem:[%s1124_s1 + $0x3b0] sm:$0xff]  ;;  %v292_v51 = vld [vmem:[%s1124_s1 + $0x3c8] sm:$0xff]  ;;  %v294_v53 = vld [vmem:[%s1124_s1 + $0x3d8] sm:$0xff]  ;;  %v595_v55 = vpack.c.bf16 %v287_v47, %v283_v46 }
  0x2e   : > { %576 = vmatpush1.bf16.msra.mxu0 %v575_v58  ;;  %v296_v52 = vld [vmem:[%s1124_s1 + $0x3e8] sm:$0xff]  ;;  %v298_v54 = vld [vmem:[%s1124_s1 + $0x3f8] sm:$0xff]  ;;  %v659_v56 = vpack.c.bf16 %v289_v50, %v285_v48  ;;  %v291_v58 = vld [vmem:[%s1124_s1 + $0x3c0] sm:$0xff] }
  0x2f   : > { %640 = vmatpush1.bf16.msra.mxu1 %v639_v59  ;;  %578 = vmatprep.subr.bf16.mxu0 %v577_v60  ;;  %v597_v57 = vpack.c.bf16 %v296_v52, %v292_v51  ;;  %v295_v59 = vld [vmem:[%s1124_s1 + $0x3e0] sm:$0xff]  ;;  %v661_v60 = vpack.c.bf16 %v298_v54, %v294_v53  ;;  %v293_v61 = vld [vmem:[%s1124_s1 + $0x3d0] sm:$0xff] }
  0x30   : > { %642 = vmatprep.subr.bf16.mxu1 %v641_v0  ;;  %v297_v62 = vld [vmem:[%s1124_s1 + $0x3f0] sm:$0xff]  ;;  %v599_v63 = vpack.c.bf16 %v295_v59, %v291_v58  ;;  %v321_v1 = vld [vmem:[%s1001_s27] sm:$0xff] }
  0x31   : > { %v663_v0 = vpack.c.bf16 %v297_v62, %v293_v61  ;;  %v299_v5 = vld [vmem:[%s1125_s2] sm:$0xf] }
  0x32   : > { %580 = vmatpush1.bf16.msra.mxu0 %v579_v6  ;;  %v311_v6 = vsub.s32 2, %v302_v3  ;;  %v308_v11 = vrot.slane %v299_v5, %v307_v7 }
  0x33   : > { %644 = vmatpush1.bf16.msra.mxu1 %v643_v8  ;;  %582 = vmatprep.subr.bf16.mxu0 %v581_v9  ;;  %v315_v8 = vsub.s32 3, %v302_v3  ;;  %v304_v9 = vrot.slane %v299_v5, %v303_v4 }
  0x34   : > { %646 = vmatprep.subr.bf16.mxu1 %v645_v13  ;;  %v312_v10 = vrot.slane %v299_v5, %v311_v6 }
  0x35   : > { %v316_v12 = vrot.slane %v299_v5, %v315_v8 }
  0x36   : > { %584 = vmatpush1.bf16.msra.mxu0 %v583_v19 }
  0x37   : > { %648 = vmatpush1.bf16.msra.mxu1 %v647_v20  ;;  %586 = vmatprep.subr.bf16.mxu0 %v585_v21 }
  0x38   : > { %650 = vmatprep.subr.bf16.mxu1 %v649_v25 }
  0x3a   : > { %588 = vmatpush1.bf16.msra.mxu0 %v587_v31 }
  0x3b   : > { %652 = vmatpush1.bf16.msra.mxu1 %v651_v32  ;;  %590 = vmatprep.subr.bf16.mxu0 %v589_v33 }
  0x3c   : > { %654 = vmatprep.subr.bf16.mxu1 %v653_v37 }
  0x3e   : > { %592 = vmatpush1.bf16.msra.mxu0 %v591_v43 }
  0x3f   : > { %656 = vmatpush1.bf16.msra.mxu1 %v655_v44  ;;  %594 = vmatprep.subr.bf16.mxu0 %v593_v45 }
  0x40   : > { %658 = vmatprep.subr.bf16.mxu1 %v657_v49 }
  0x42   : > { %596 = vmatpush1.bf16.msra.mxu0 %v595_v55 }
  0x43   : > { %660 = vmatpush1.bf16.msra.mxu1 %v659_v56  ;;  %598 = vmatprep.subr.bf16.mxu0 %v597_v57 }
  0x44   : > { %662 = vmatprep.subr.bf16.mxu1 %v661_v60 }
  0x46   : > { %600 = vmatpush1.bf16.msra.mxu0 %v599_v63 }
  0x47   : > { %664 = vmatpush1.bf16.msra.mxu1 %v663_v0 }
  0x49   : > { %388 = vmatmul.mubr.f32.vlgmr.msra.gmra.mrb[0].mxu0 %v321_v1 }
  0x4a   : > { %459 = vmatmul.mubr.f32.vlgmr.msra.gmra.mrb[0].mxu1 %v321_v1 }
 0x11c   : > { %v389_v13 = vpop.f32.mrb[0].mxu0 }
 0x11d   : > { %v390_v14 = vadd.f32 %v389_v13, %v304_v9  ;;  %v460_v15 = vpop.f32.mrb[0].mxu1  ;;  %v391_v16 = vpop.f32.mrb[1].mxu0 }
 0x11e   : > { %v461_v17 = vadd.f32 %v460_v15, %v312_v10  ;;  %v392_v18 = vadd.f32 %v391_v16, %v308_v11  ;;  %v462_v19 = vpop.f32.mrb[1].mxu1 }
 0x11f   : > { %465 = vst [vmem:[%s170_s5] sm:$0xff] %v390_v14  ;;  %v463_v20 = vadd.f32 %v462_v19, %v316_v12 }
 0x120   : > { %467 = vst [vmem:[%s170_s5 + $0x10] sm:$0xff] %v461_v17  ;;  %466 = vst [vmem:[%s170_s5 + $0x8] sm:$0xff] %v392_v18 }
 0x121   : > { %468 = vst [vmem:[%s170_s5 + $0x18] sm:$0xff] %v463_v20 }
 0x122 PF: > { %s13_s12 = sadd.s32 1, %s679_s12  }
 0x123   : > { %p10_p4 = scmp.ge.s32.totalorder %s13_s12, 4  }
 0x125   :  { %12 = sbr.rel (!%p10_p4) target bundleno = 1 (0x1), region = 62 }

</bundles_post_ra>
